<compile_context>
chip_gen: v7x
topology: tpu7x:2x2x1
jax: 0.10.0
libtpu: 0.0.40
codegen_flags: <defaults>
</compile_context>

<pallas_src>
import jax
import jax.numpy as jnp
from jax.experimental import pallas as pl
from jax.experimental.pallas import tpu as pltpu
from jax.scipy.linalg import block_diag

# ---- irreps configuration ---------------------------------------------------
C0_IN, C1_IN = 8, 4            # input:  8x0e + 4x1e
C0_MID, C1_MID = 16, 8         # mid:    16x0e + 8x1e (plus C1_MID extra 0e gates)
C0_OUT, C1_OUT = 8, 4          # output: 8x0e + 4x1e
S_MID = C0_MID + C1_MID        # 24 scalar outputs of fctp_1 (kept scalars + gates)

F_IN = C0_IN + 3 * C1_IN       # 20 input rows   [8 scalars | 1e, e3nn (mul,m) order]
F_MID = S_MID + 3 * C1_MID     # 48 rows after fctp_1 [24 scalars | 1e, m-major]
F_OUT = C0_OUT + 3 * C1_OUT    # 20 output rows  [8 scalars | 1e, m-major]

# packed-parameter slab layout (single grid-invariant operand -> one small DMA)
_W2S_ROW = F_MID                          # rows 48:56  -> W2 scalar block (8,16)
_W2V_ROW = F_MID + C0_OUT                 # rows 56:68  -> W2 1e block-diag (12,24)
_WP_ROWS_PAD = 72                         # 68 used, padded to a multiple of 8
_B1_COL = 3 * C1_MID                      # col 24      -> fctp_1 scalar bias (24,)
_B2_COL = _B1_COL + 1                     # col 25      -> fctp_2 scalar bias (8,)
_WP_COLS = 32

N_NODES = 1024

# kernel output 1e rows are m-major (row 8 + 4m + d); e3nn wants col 8 + 3d + m
_OUT_PERM = tuple(range(C0_OUT)) + tuple(
    C0_OUT + 4 * m + d for d in range(C1_OUT) for m in range(3))


def _ffn_kernel(x_ref, y_ref, wp_ref, o_ref):
    f32 = jnp.float32
    # inputs may arrive as bf16 (HBM-traffic optimization); all math is f32.
    y = y_ref[...].astype(f32)                              # (1, tn) node_attr
    xy = x_ref[...].astype(f32) * y                         # (20, tn): scale before W1
                                                            # (20 rows touched, not 48)

    # -------- fctp_1 : fused block-diagonal TP, one MXU matmul ---------------
    w1 = wp_ref[0:F_MID, 0:F_IN]                            # (48, 20) f32, VMEM-resident
    mid = jnp.dot(w1, xy, preferred_element_type=f32)       # (48, tn)

    b1 = wp_ref[0:S_MID, _B1_COL:_B1_COL + 1]               # (24, 1) bias (0e only)
    s = mid[0:C0_MID] + b1[0:C0_MID]                        # kept scalars (16, tn)
    g = jax.nn.sigmoid(mid[C0_MID:S_MID] + b1[C0_MID:S_MID])  # gates (8, tn)
    s = s * jax.nn.sigmoid(s)                               # SiLU

    # -------- Gate: per-m-block, 8-aligned slices (no 24-row gate tile) ------
    vec = jnp.concatenate(
        [mid[S_MID + 0 * C1_MID:S_MID + 1 * C1_MID] * g,
         mid[S_MID + 1 * C1_MID:S_MID + 2 * C1_MID] * g,
         mid[S_MID + 2 * C1_MID:S_MID + 3 * C1_MID] * g],
        axis=0)                                             # (24, tn) gated 1e (m-major)

    # -------- fctp_2 : split block-diagonal matmuls (no 40-row h concat) -----
    w2s = wp_ref[_W2S_ROW:_W2S_ROW + C0_OUT, 0:C0_MID]          # (8, 16)
    w2v = wp_ref[_W2V_ROW:_W2V_ROW + 3 * C1_OUT, 0:3 * C1_MID]  # (12, 24)
    b2 = wp_ref[0:C0_OUT, _B2_COL:_B2_COL + 1]                  # (8, 1)

    out_s = jnp.dot(w2s, s, preferred_element_type=f32) * y + b2    # (8, tn)
    out_v = jnp.dot(w2v, vec, preferred_element_type=f32) * y       # (12, tn)
    o_ref[...] = jnp.concatenate([out_s, out_v], axis=0).astype(o_ref.dtype)


def _round_up(x, m):
    return ((x + m - 1) // m) * m


def _pick_node_tile(n):
    """Few, large node tiles: per-grid-step overhead dominates this tiny
    memory-bound op.  Two tiles (marked 'parallel') let v7x use both of its
    TensorCores; the 16K-lane cap keeps double-buffered blocks far below v7x's
    64 MiB VMEM.  For very large graphs sweep 8K-32K lanes per tile."""
    max_tile = 16384
    if n <= 256:
        return _round_up(max(n, 1), 128)
    return min(max_tile, _round_up(-(-n // 2), 128))


def _pack_params(params):
    """Fuse per-degree FCTP weights into block matrices and pack everything
    (W1, W2_scalar, W2_1e, b1, b2) into one grid-invariant f32 slab so the
    kernel sees a single small weight DMA instead of six tiny operands."""
    w0a, w1a, b0a, w0b, w1b, b0b = params
    f32 = jnp.float32

    # fctp_1: output rows are [24 scalars | 1e m-major]; input columns follow the
    # raw e3nn layout [8 scalars | 1e (mul,m)-interleaved], so the wrapper needs
    # no input permutation, only a plain transpose.
    w1_full = jnp.zeros((F_MID, F_IN), f32)
    w1_full = w1_full.at[:S_MID, :C0_IN].set(w0a.T.astype(f32))
    blk = jnp.einsum("cd,mk->mdck", w1a.astype(f32), jnp.eye(3, dtype=f32))
    w1_full = w1_full.at[S_MID:, C0_IN:].set(blk.reshape(3 * C1_MID, 3 * C1_IN))

    # fctp_2: scalar mixing and block-diagonal 1e mixing (m-major)
    w2s = w0b.T.astype(f32)                                        # (8, 16)
    w2v = block_diag(w1b.T, w1b.T, w1b.T).astype(f32)              # (12, 24)

    wp = jnp.zeros((_WP_ROWS_PAD, _WP_COLS), f32)
    wp = wp.at[0:F_MID, 0:F_IN].set(w1_full)
    wp = wp.at[_W2S_ROW:_W2S_ROW + C0_OUT, 0:C0_MID].set(w2s)
    wp = wp.at[_W2V_ROW:_W2V_ROW + 3 * C1_OUT, 0:3 * C1_MID].set(w2v)
    wp = wp.at[0:S_MID, _B1_COL].set(b0a[0].astype(f32))
    wp = wp.at[0:C0_OUT, _B2_COL].set(b0b[0].astype(f32))
    return wp


def feed_forward_network(x_packed, y, params, *, node_tile=None,
                         compute_dtype=jnp.float32):
    """x_packed: (N, 20) e3nn layout [8x0e | 4x1e]; y: (N, 1) scalar node attr.

    `compute_dtype=jnp.bfloat16` halves the dominant HBM traffic (x / out
    streams); the kernel always accumulates in f32 and the (tiny) weights stay
    in f32.  Layout plumbing is a single fused gather+transpose per side.
    """
    n = x_packed.shape[0]
    x_t = x_packed.T.astype(compute_dtype)            # (F_IN, N) nodes-on-lanes
    y_t = y.T.astype(compute_dtype)                   # (1, N)
    wp = _pack_params(params)                         # (72, 32) f32, ~9 KB

    if node_tile is None:
        node_tile = _pick_node_tile(n)
    n_pad = _round_up(n, node_tile)
    if n_pad != n:
        x_t = jnp.pad(x_t, ((0, 0), (0, n_pad - n)))
        y_t = jnp.pad(y_t, ((0, 0), (0, n_pad - n)))

    out_t = pl.pallas_call(
        _ffn_kernel,
        out_shape=jax.ShapeDtypeStruct((F_OUT, n_pad), compute_dtype),
        grid_spec=pltpu.PrefetchScalarGridSpec(
            num_scalar_prefetch=0,
            grid=(n_pad // node_tile,),
            in_specs=[
                pl.BlockSpec((F_IN, node_tile), lambda i: (0, i)),
                pl.BlockSpec((1, node_tile), lambda i: (0, i)),
                pl.BlockSpec((_WP_ROWS_PAD, _WP_COLS), lambda i: (0, 0)),
            ],
            out_specs=pl.BlockSpec((F_OUT, node_tile), lambda i: (0, i)),
        ),
        compiler_params=pltpu.CompilerParams(
            dimension_semantics=("parallel",)),
    )(x_t, y_t, wp)

    # back to e3nn layout: one gather+transpose (fused by XLA)
    out_t = out_t[:, :n]
    return out_t[jnp.array(_OUT_PERM), :].T


def _reference(x_packed, y, params):
    """Pure-JAX reference of the same forward pass (e3nn layout)."""
    w0a, w1a, b0a, w0b, w1b, b0b = params
    n = x_packed.shape[0]
    x_s = x_packed[:, :C0_IN]
    x_v = x_packed[:, C0_IN:].reshape(n, C1_IN, 3)

    s = x_s @ w0a * y + b0a
    v = jnp.einsum("ncm,cd->ndm", x_v, w1a) * y[..., None]
    scal, gates = s[:, :C0_MID], s[:, C0_MID:]
    scal = scal * jax.nn.sigmoid(scal)
    gates = jax.nn.sigmoid(gates)
    v = v * gates[..., None]

    out_s = scal @ w0b * y + b0b
    out_v = jnp.einsum("ncm,cd->ndm", v, w1b) * y[..., None]
    return jnp.concatenate([out_s, out_v.reshape(n, C1_OUT * 3)], axis=-1)


def init_params(key):
    ks = jax.random.split(key, 6)
    # rescale: fold 1/sqrt(fan_in) into the weights (Equiformer _RESCALE)
    w0a = jax.random.normal(ks[0], (C0_IN, S_MID), jnp.float32) / jnp.sqrt(C0_IN)
    w1a = jax.random.normal(ks[1], (C1_IN, C1_MID), jnp.float32) / jnp.sqrt(C1_IN)
    b0a = jax.random.normal(ks[2], (1, S_MID), jnp.float32) * 0.1
    w0b = jax.random.normal(ks[3], (C0_MID, C0_OUT), jnp.float32) / jnp.sqrt(C0_MID)
    w1b = jax.random.normal(ks[4], (C1_MID, C1_OUT), jnp.float32) / jnp.sqrt(C1_MID)
    b0b = jax.random.normal(ks[5], (1, C0_OUT), jnp.float32) * 0.1
    return (w0a, w1a, b0a, w0b, w1b, b0b)


if __name__ == "__main__":
    key = jax.random.PRNGKey(0)
    k_x, k_y, k_p = jax.random.split(key, 3)

    x = jax.random.normal(k_x, (N_NODES, C0_IN + 3 * C1_IN), jnp.float32)
    # scalar node attr (Equiformer commonly passes ones; keep it non-trivial here)
    y = 1.0 + 0.1 * jax.random.normal(k_y, (N_NODES, 1), jnp.float32)
    params = init_params(k_p)

    # ---- f32 path: strict numerical check against the pure-JAX reference ----
    ffn_f32 = jax.jit(
        lambda a, b, p: feed_forward_network(a, b, p, compute_dtype=jnp.float32))
    out = jax.block_until_ready(ffn_f32(x, y, params))
    ref = _reference(x, y, params)
    assert out.shape == (N_NODES, C0_OUT + 3 * C1_OUT)
    assert jnp.allclose(out, ref, atol=1e-4, rtol=1e-4), float(
        jnp.max(jnp.abs(out - ref)))

    # ---- bf16-at-the-boundary path (perf review): bf16 I/O, f32 math --------
    ffn_bf16 = jax.jit(
        lambda a, b, p: feed_forward_network(a, b, p, compute_dtype=jnp.bfloat16))
    out_bf = jax.block_until_ready(ffn_bf16(x, y, params)).astype(jnp.float32)
    _r = lambda a: a.astype(jnp.bfloat16).astype(jnp.float32)
    ref_bf = _reference(_r(x), _r(y), params)   # same weights (kernel keeps f32 weights)
    assert jnp.allclose(out_bf, ref_bf, atol=3e-2, rtol=3e-2), float(
        jnp.max(jnp.abs(out_bf - ref_bf)))

    print("KERNEL_OK")
</pallas_src>

<mosaic_0001>
module attributes {stable_mosaic.version = 11 : i64} {
  func.func @_ffn_kernel(%arg0: i32, %arg1: memref<20x512xf32, #tpu.memory_space<vmem>>, %arg2: memref<1x512xf32, #tpu.memory_space<vmem>>, %arg3: memref<72x32xf32, #tpu.memory_space<vmem>>, %arg4: memref<20x512xf32, #tpu.memory_space<vmem>>) attributes {dimension_semantics = [#tpu.dimension_semantics<parallel>], iteration_bounds = array<i64: 2>, scalar_prefetch = 0 : i64, scratch_operands = 0 : i64, tpu.core_type = #tpu.core_type<tc>, window_params = [{transform_indices = @transform_0, window_bounds = array<i64: 20, 512>}, {transform_indices = @transform_1, window_bounds = array<i64: 1, 512>}, {pipeline_mode = #tpu.pipeline_mode<synchronous>, transform_indices = @transform_2, window_bounds = array<i64: 72, 32>}, {transform_indices = @transform_3, window_bounds = array<i64: 20, 512>}]} {
    %c0 = arith.constant 0 : index
    %c0_0 = arith.constant 0 : index
    %0 = vector.load %arg2[%c0, %c0_0] : memref<1x512xf32, #tpu.memory_space<vmem>>, vector<1x512xf32>
    %c0_1 = arith.constant 0 : index
    %c0_2 = arith.constant 0 : index
    %1 = vector.load %arg1[%c0_1, %c0_2] : memref<20x512xf32, #tpu.memory_space<vmem>>, vector<20x512xf32>
    %2 = vector.broadcast %0 : vector<1x512xf32> to vector<20x512xf32>
    %3 = arith.mulf %1, %2 : vector<20x512xf32>
    %c0_3 = arith.constant 0 : index
    %c0_4 = arith.constant 0 : index
    %4 = vector.load %arg3[%c0_3, %c0_4] : memref<72x32xf32, #tpu.memory_space<vmem>>, vector<48x20xf32>
    %cst = arith.constant dense<0.000000e+00> : vector<48x512xf32>
    %5 = tpu.matmul %4, %3, %cst {dimension_numbers = #tpu.dot_dimension_numbers<[1], [0], [0], [1], [0, 0, 1, 1], [], []>} : vector<48x20xf32>, vector<20x512xf32>, vector<48x512xf32> -> vector<48x512xf32>
    %c0_5 = arith.constant 0 : index
    %c24 = arith.constant 24 : index
    %6 = vector.load %arg3[%c0_5, %c24] : memref<72x32xf32, #tpu.memory_space<vmem>>, vector<24x1xf32>
    %7 = vector.extract_strided_slice %5 {offsets = [0, 0], sizes = [16, 512], strides = [1, 1]} : vector<48x512xf32> to vector<16x512xf32>
    %8 = vector.extract_strided_slice %6 {offsets = [0, 0], sizes = [16, 1], strides = [1, 1]} : vector<24x1xf32> to vector<16x1xf32>
    %9 = vector.broadcast %8 : vector<16x1xf32> to vector<16x512xf32>
    %10 = arith.addf %7, %9 : vector<16x512xf32>
    %11 = vector.extract_strided_slice %5 {offsets = [16, 0], sizes = [8, 512], strides = [1, 1]} : vector<48x512xf32> to vector<8x512xf32>
    %12 = vector.extract_strided_slice %6 {offsets = [16, 0], sizes = [8, 1], strides = [1, 1]} : vector<24x1xf32> to vector<8x1xf32>
    %13 = vector.broadcast %12 : vector<8x1xf32> to vector<8x512xf32>
    %14 = arith.addf %11, %13 : vector<8x512xf32>
    %15 = arith.negf %14 : vector<8x512xf32>
    %16 = math.exp %15 : vector<8x512xf32>
    %cst_6 = arith.constant 1.000000e+00 : f32
    %17 = vector.broadcast %cst_6 : f32 to vector<8x512xf32>
    %18 = arith.addf %17, %16 : vector<8x512xf32>
    %19 = arith.divf %17, %18 : vector<8x512xf32>
    %20 = arith.negf %10 : vector<16x512xf32>
    %21 = math.exp %20 : vector<16x512xf32>
    %cst_7 = arith.constant 1.000000e+00 : f32
    %22 = vector.broadcast %cst_7 : f32 to vector<16x512xf32>
    %23 = arith.addf %22, %21 : vector<16x512xf32>
    %24 = arith.divf %22, %23 : vector<16x512xf32>
    %25 = arith.mulf %10, %24 : vector<16x512xf32>
    %26 = vector.extract_strided_slice %5 {offsets = [24, 0], sizes = [8, 512], strides = [1, 1]} : vector<48x512xf32> to vector<8x512xf32>
    %27 = arith.mulf %26, %19 : vector<8x512xf32>
    %28 = vector.extract_strided_slice %5 {offsets = [32, 0], sizes = [8, 512], strides = [1, 1]} : vector<48x512xf32> to vector<8x512xf32>
    %29 = arith.mulf %28, %19 : vector<8x512xf32>
    %30 = vector.extract_strided_slice %5 {offsets = [40, 0], sizes = [8, 512], strides = [1, 1]} : vector<48x512xf32> to vector<8x512xf32>
    %31 = arith.mulf %30, %19 : vector<8x512xf32>
    %32 = tpu.concatenate %27, %29, %31 in 0 : vector<8x512xf32>, vector<8x512xf32>, vector<8x512xf32> -> vector<24x512xf32>
    %c48 = arith.constant 48 : index
    %c0_8 = arith.constant 0 : index
    %33 = vector.load %arg3[%c48, %c0_8] : memref<72x32xf32, #tpu.memory_space<vmem>>, vector<8x16xf32>
    %c56 = arith.constant 56 : index
    %c0_9 = arith.constant 0 : index
    %34 = vector.load %arg3[%c56, %c0_9] : memref<72x32xf32, #tpu.memory_space<vmem>>, vector<12x24xf32>
    %c0_10 = arith.constant 0 : index
    %c25 = arith.constant 25 : index
    %35 = vector.load %arg3[%c0_10, %c25] : memref<72x32xf32, #tpu.memory_space<vmem>>, vector<8x1xf32>
    %cst_11 = arith.constant dense<0.000000e+00> : vector<8x512xf32>
    %36 = tpu.matmul %33, %25, %cst_11 {dimension_numbers = #tpu.dot_dimension_numbers<[1], [0], [0], [1], [0, 0, 1, 1], [], []>} : vector<8x16xf32>, vector<16x512xf32>, vector<8x512xf32> -> vector<8x512xf32>
    %37 = vector.broadcast %0 : vector<1x512xf32> to vector<8x512xf32>
    %38 = arith.mulf %36, %37 : vector<8x512xf32>
    %39 = vector.broadcast %35 : vector<8x1xf32> to vector<8x512xf32>
    %40 = arith.addf %38, %39 : vector<8x512xf32>
    %cst_12 = arith.constant dense<0.000000e+00> : vector<12x512xf32>
    %41 = tpu.matmul %34, %32, %cst_12 {dimension_numbers = #tpu.dot_dimension_numbers<[1], [0], [0], [1], [0, 0, 1, 1], [], []>} : vector<12x24xf32>, vector<24x512xf32>, vector<12x512xf32> -> vector<12x512xf32>
    %42 = vector.broadcast %0 : vector<1x512xf32> to vector<12x512xf32>
    %43 = arith.mulf %41, %42 : vector<12x512xf32>
    %44 = tpu.concatenate %40, %43 in 0 : vector<8x512xf32>, vector<12x512xf32> -> vector<20x512xf32>
    %c0_13 = arith.constant 0 : index
    %c0_14 = arith.constant 0 : index
    %45 = vector.load %arg4[%c0_13, %c0_14] : memref<20x512xf32, #tpu.memory_space<vmem>>, vector<20x512xf32>
    tpu.vector_store %arg4[%c0_13, %c0_14], %44 {strides = array<i32>} : memref<20x512xf32, #tpu.memory_space<vmem>>, vector<20x512xf32>,
    return
  }
  func.func @transform_0(%arg0: i32) -> (i32, i32) {
    %c0_i32 = arith.constant 0 : i32
    %c0_i32_0 = arith.constant 0 : i32
    return %c0_i32, %arg0 : i32, i32
  }
  func.func @transform_1(%arg0: i32) -> (i32, i32) {
    %c0_i32 = arith.constant 0 : i32
    %c0_i32_0 = arith.constant 0 : i32
    return %c0_i32, %arg0 : i32, i32
  }
  func.func @transform_2(%arg0: i32) -> (i32, i32) {
    %c0_i32 = arith.constant 0 : i32
    %c0_i32_0 = arith.constant 0 : i32
    %c0_i32_1 = arith.constant 0 : i32
    return %c0_i32, %c0_i32_0 : i32, i32
  }
  func.func @transform_3(%arg0: i32) -> (i32, i32) {
    %c0_i32 = arith.constant 0 : i32
    %c0_i32_0 = arith.constant 0 : i32
    return %c0_i32, %arg0 : i32, i32
  }
}

</mosaic_0001>

<bundles_post_ra>
// kernel: _lambda_.1
= control target key start
LH: loop header
LB: loop body
LE: loop exit
PB: predicated region body
PF: predicated region fallthrough
CT: control target
= control target key end

     0   :  { %s1294_s12 = smov 0   ;;  %s1296_s13 = smov 0   ;;  %s1547_s0 = inlined_call_operand.vmem [shape: f32[20,1024], index: 0, kind: input, shape index: {}]   ;;  %s1548_s1 = inlined_call_operand.vmem [shape: f32[1,1024], index: 1, kind: input, shape index: {}]   ;;  %s1549_s2 = inlined_call_operand.vmem [shape: f32[72,32], index: 2, kind: input, shape index: {}]   ;;  %s1550_s3 = inlined_call_operand.vmem [shape: f32[20,1024], index: 3, kind: output, shape index: {}]  }
   0x1   :  { %s1298_s14 = smov 0  }
   0x2 LB: > { %s1310_s15 = sadd.s32 4294967295, %s1269_s14   ;;  %s1313_s16 = sadd.s32 1, %s1269_s14   ;;  %s1269_s14 = sphi %s1298_s14, %s1554_s14   ;;  %s1265_s13 = sphi %s1296_s13, %s1553_s13   ;;  %s1261_s12 = sphi %s1294_s12, %s1552_s12  }
   0x3   : > { %s17_s17 = ssub.s32 %s1269_s14, %s1313_s16  ;;  %s20_s18 = sadd.s32 1, %s1265_s13 }
   0x4   : > { %p18_p0 = scmp.eq.s32.totalorder %s17_s17, 0  ;;  %p27_p1 = scmp.ne.s32.totalorder %s1265_s13, %s1261_s12 }
   0x5   : > { %p28_p2 = scmp.eq.s32.totalorder %s1269_s14, 0  ;;  %p104_p3 = scmp.eq.s32.totalorder %s1310_s15, 1 }
   0x6   : > { %s1323_s19 = scalar_select %p18_p0, %s1265_s13, %s20_s18  }
   0x7   : > { %p29_p4 = por %p28_p2, %p27_p1  ;;  %p1325_p5 = por %p104_p3, %p27_p1 }
   0x8   : > { %p1097_p6 = scmp.ge.s32.totalorder %s1269_s14, 2 }
   0xa   : > { %129 = sbr.rel (%p1097_p6) target bundleno = 28 (0x1c), region = 20 }
  0x11   : > { %132 = sbr.rel (!%p29_p4) target bundleno = 28 (0x1c), region = 24  ;;  %s134_s21 = sand.u32 (%p29_p4), 1, %s1265_s13  }
  0x12   : > { %s1140_s22 = sshll.u32 (%p29_p4), %s1269_s14, 5  ;;  %s1166_s23 = smul.u32 (%p29_p4), 96, %s134_s21 }
  0x13   : > { %s139_s26 = scalar_lea.vmem (%p29_p4), %s1547_s0, %s1140_s22 }
  0x14   : > { %v152_v0 = vld [vmem:[%s139_s26] sm:$0xff] (%p29_p4)  ;;  %v154_v1 = vld [vmem:[%s139_s26 + $0x8] sm:$0xff] (%p29_p4)  ;;  %v156_v2 = vld [vmem:[%s139_s26 + $0x10] sm:$0xff] (%p29_p4)  ;;  %s136_s27 = scalar_lea.vmem (%p29_p4), [#allocation2], %s1166_s23 }
  0x15   : > { %v158_v3 = vld [vmem:[%s139_s26 + $0x18] sm:$0xff] (%p29_p4)  ;;  %v160_v4 = vld [vmem:[%s139_s26 + $0x40] sm:$0xff] (%p29_p4)  ;;  %v162_v5 = vld [vmem:[%s139_s26 + $0x48] sm:$0xff] (%p29_p4)  ;;  %153 = vst [vmem:[%s136_s27] sm:$0xff] (%p29_p4), %v152_v0 }
  0x16   : > { %155 = vst [vmem:[%s136_s27 + $0x8] sm:$0xff] (%p29_p4), %v154_v1  ;;  %157 = vst [vmem:[%s136_s27 + $0x10] sm:$0xff] (%p29_p4), %v156_v2  ;;  %v164_v6 = vld [vmem:[%s139_s26 + $0x50] sm:$0xff] (%p29_p4)  ;;  %v166_v7 = vld [vmem:[%s139_s26 + $0x58] sm:$0xff] (%p29_p4) }
  0x17   : > { %159 = vst [vmem:[%s136_s27 + $0x18] sm:$0xff] (%p29_p4), %v158_v3  ;;  %161 = vst [vmem:[%s136_s27 + $0x20] sm:$0xff] (%p29_p4), %v160_v4  ;;  %v168_v8 = vld [vmem:[%s139_s26 + $0x80] sm:$0xff] (%p29_p4)  ;;  %v170_v9 = vld [vmem:[%s139_s26 + $0x88] sm:$0xff] (%p29_p4) }
  0x18   : > { %163 = vst [vmem:[%s136_s27 + $0x28] sm:$0xff] %v162_v5  ;;  %165 = vst [vmem:[%s136_s27 + $0x30] sm:$0xff] %v164_v6  ;;  %v172_v10 = vld [vmem:[%s139_s26 + $0x90] sm:$0xff]  ;;  %v174_v11 = vld [vmem:[%s139_s26 + $0x98] sm:$0xff] }
  0x19   : > { %167 = vst [vmem:[%s136_s27 + $0x38] sm:$0xff] %v166_v7  ;;  %169 = vst [vmem:[%s136_s27 + $0x40] sm:$0xff] %v168_v8 }
  0x1a   : > { %171 = vst [vmem:[%s136_s27 + $0x48] sm:$0xff] %v170_v9  ;;  %173 = vst [vmem:[%s136_s27 + $0x50] sm:$0xff] %v172_v10 }
  0x1b   : > { %175 = vst [vmem:[%s136_s27 + $0x58] sm:$0xff] %v174_v11 }
  0x1c PF: > { %p1100_p7 = scmp.ge.s32.totalorder %s1269_s14, 1  ;;  %p188_p8 = scmp.lt.s32.totalorder %s1269_s14, 3 }
  0x1e   : > { %p189_p9 = pnand %p1100_p7, %p188_p8 }
  0x1f   : > { %s195_s28 = sand.u32 (!%p189_p9), 1, %s1261_s12   ;;  %s1101_s29 = sshll.u32 (!%p189_p9), %s1310_s15, 2  ;;  %v242_v12 = vlaneseq (!%p189_p9)  ;;  %v1271_v13 = vmov (!%p189_p9), 0.0   ;;  %v1346_v15 = vld [vmem:[%s1549_s2] sm:$0xff] (!%p189_p9)  ;;  %v1351_v16 = vld [vmem:[%s1549_s2 + $0x10] sm:$0xff] (!%p189_p9)  ;;  %v1272_v17 = vmov (!%p189_p9), 24  }
  0x20   : > { %192 = sbr.rel (%p189_p9) target bundleno = 544 (0x220), region = 51  ;;  %p223_p10 = scmp.lt.s32.totalorder (!%p189_p9), %s1101_s29, 7  ;;  %376 = vmatprep.mubr.f32.mxu0 (!%p189_p9), %v1271_v13  ;;  %477 = vmatprep.mubr.f32.mxu1 (!%p189_p9), %v1271_v13  ;;  %v275_v22 = vld [vmem:[%s1549_s2 + $0x8] sm:$0xff] (!%p189_p9)  ;;  %vm299_vm0 = vcmask (!%p189_p9), 1043456   ;;  %vm280_vm1 = vcmask (!%p189_p9), 162816   ;;  %v277_v56 = vld [vmem:[%s1549_s2 + $0x18] sm:$0xff] (!%p189_p9) }
  0x21   : > { %s1339_s30 = smul.u32 (!%p189_p9), 96, %s195_s28  ;;  %v243_v14 = vshrl.u32 (!%p189_p9), %v242_v12, 7  ;;  %1195 = vset.pattern.permute.xlu0 (!%p189_p9), %v1272_v17  ;;  %1196 = vset.pattern.permute.xlu1 (!%p189_p9), %v1272_v17  ;;  %v278_v57 = vld [vmem:[%s1549_s2 + $0x20] sm:$0xff] (!%p189_p9)  ;;  %v279_v58 = vld [vmem:[%s1549_s2 + $0x28] sm:$0xff] (!%p189_p9)  ;;  %v1273_v59 = vmov (!%p189_p9), 25   ;;  %vm640_vm2 = vcmask (!%p189_p9), 130048  }
  0x22   : > { %519 = vperm.xlu0 (!%p189_p9), %1195, %v1346_v15   ;;  %537 = vperm.xlu1 (!%p189_p9), %1196, %v1351_v16   ;;  %vm799_vm3 = vcmask (!%p189_p9), 195584  }
  0x23   : > { %v248_v18 = vsub.s32 (!%p189_p9), 1, %v243_v14  ;;  %v256_v19 = vsub.s32 (!%p189_p9), 3, %v243_v14  ;;  %v244_v20 = vsub.s32 (!%p189_p9), 0, %v243_v14  ;;  %v252_v21 = vsub.s32 (!%p189_p9), 2, %v243_v14  ;;  %s197_s14 = scalar_lea.vmem (!%p189_p9), [#allocation2], %s1339_s30  ;;  %s1497_s5 = scalar_lea.vmem (!%p189_p9), [#allocation3], %s1339_s30 }
  0x24   : > { %v230_v23 = vld [vmem:[%s197_s14 + $0x8] sm:$0xff] (!%p189_p9)  ;;  %v232_v25 = vld [vmem:[%s197_s14 + $0x18] sm:$0xff] (!%p189_p9)  ;;  %v229_v28 = vld [vmem:[%s197_s14] sm:$0xff] (!%p189_p9) }
  0x25   : > { %v234_v24 = vld [vmem:[%s197_s14 + $0x28] sm:$0xff] (!%p189_p9)  ;;  %v236_v27 = vld [vmem:[%s197_s14 + $0x38] sm:$0xff] (!%p189_p9)  ;;  %v233_v31 = vld [vmem:[%s197_s14 + $0x20] sm:$0xff] (!%p189_p9) }
  0x26   : > { %524 = vperm.xlu0 (!%p189_p9), %1195, %v275_v22   ;;  %v231_v33 = vld [vmem:[%s197_s14 + $0x10] sm:$0xff] (!%p189_p9)  ;;  %v238_v36 = vld [vmem:[%s197_s14 + $0x48] sm:$0xf] (!%p189_p9)  ;;  %v240_v37 = vld [vmem:[%s197_s14 + $0x58] sm:$0xf] (!%p189_p9)  ;;  %1197 = vset.pattern.permute.xlu1 (!%p189_p9), %v1273_v59 }
  0x27   : > { %s1556_s29 = smov (!%p223_p10, %s1101_s29), 7  ;;  %v235_v34 = vld [vmem:[%s197_s14 + $0x30] sm:$0xff]  ;;  %v237_v50 = vld [vmem:[%s197_s14 + $0x40] sm:$0xf]  ;;  %792 = vperm.xlu1 %1197, %v1346_v15   ;;  %s1141_s30 = sshll.u32 (%p1325_p5), %s1310_s15, 5 }
  0x28   : > { %s225_s12 = scalar_lea.vmem %s1548_s1, %s1556_s29  ;;  %v239_v51 = vld [vmem:[%s197_s14 + $0x50] sm:$0xf]  ;;  %s989_s8 = scalar_lea.vmem (%p1325_p5), %s1550_s3, %s1141_s30 }
  0x29   : > { %v228_v26 = vld [vmem:[%s225_s12] sm:$0xf] }
  0x2a   : > { %v1362_v29 = vrot.slane %v228_v26, %v248_v18  ;;  %v1364_v30 = vrot.slane %v228_v26, %v256_v19  ;;  %v1366_v32 = vrot.slane %v228_v26, %v244_v20  ;;  %v1368_v35 = vrot.slane %v228_v26, %v252_v21  ;;  %1198 = vset.pattern.permute.xlu0 %v1273_v59 }
  0x2c   : > { %v263_v38 = vmul.f32 %v1362_v29, %v230_v23  ;;  %v267_v39 = vmul.f32 %v1362_v29, %v234_v24  ;;  %v265_v40 = vmul.f32 %v1364_v30, %v232_v25  ;;  %v269_v41 = vmul.f32 %v1364_v30, %v236_v27 }
  0x2d   : > { %v262_v42 = vmul.f32 %v1366_v32, %v229_v28  ;;  %v266_v43 = vmul.f32 %v1366_v32, %v233_v31  ;;  %v264_v44 = vmul.f32 %v1368_v35, %v231_v33  ;;  %v268_v45 = vmul.f32 %v1368_v35, %v235_v34 }
  0x2e   : > { %v1142_v46 = vpack.c.bf16 %v267_v39, %v263_v38  ;;  %v1146_v47 = vpack.c.bf16 %v269_v41, %v265_v40  ;;  %v271_v48 = vmul.f32 %v1362_v29, %v238_v36  ;;  %v273_v49 = vmul.f32 %v1364_v30, %v240_v37 }
  0x2f   : > { %v1144_v52 = vpack.c.bf16 %v266_v43, %v262_v42  ;;  %v1148_v53 = vpack.c.bf16 %v268_v45, %v264_v44  ;;  %v270_v54 = vmul.f32 %v1366_v32, %v237_v50  ;;  %v272_v55 = vmul.f32 %v1368_v35, %v239_v51 }
  0x30   : > { %1143 = vmatprep.subr.bf16.mxu0 %v1142_v46  ;;  %1147 = vmatprep.subr.bf16.mxu1 %v1146_v47 }
  0x31   : > { %1145 = vmatpush1.bf16.msra.mxu0 %v1144_v52  ;;  %1149 = vmatpush1.bf16.msra.mxu1 %v1148_v53 }
  0x32   : > { %1102 = vmatprep.subr.msk.mxu0 %vm299_vm0, %v271_v48  ;;  %1110 = vmatprep.subr.msk.mxu1 %vm299_vm0, %v273_v49 }
  0x35   : > { %1103 = vmatpush1.msk.msra.mxu0 %vm299_vm0, %v270_v54  ;;  %1111 = vmatpush1.msk.msra.mxu1 %vm299_vm0, %v272_v55 }
  0x36   : > { %1104 = vmatmul.mubr.msk.f32.vlgmr.msra.gmra.mrb[0].mxu0 %vm280_vm1, %v1346_v15  ;;  %1112 = vmatmul.mubr.msk.f32.vlgmr.msra.gmra.mrb[0].mxu1 %vm280_vm1, %v1346_v15 }
  0x37   : > { %382 = vmatprep.mubr.f32.mxu0 %v1271_v13  ;;  %483 = vmatprep.mubr.f32.mxu1 %v1271_v13 }
  0x3a   : > { %1105 = vmatmul.mubr.msk.f32.gmra.mrb[2].mxu0 %vm280_vm1, %v275_v22  ;;  %1113 = vmatmul.mubr.msk.f32.gmra.mrb[2].mxu1 %vm280_vm1, %v275_v22 }
  0x3b   : > { %388 = vmatprep.mubr.f32.mxu0 %v1271_v13  ;;  %489 = vmatprep.mubr.f32.mxu1 %v1271_v13 }
  0x3e   : > { %1106 = vmatmul.mubr.msk.f32.gmra.mrb[4].mxu0 %vm280_vm1, %v1351_v16  ;;  %1114 = vmatmul.mubr.msk.f32.gmra.mrb[4].mxu1 %vm280_vm1, %v1351_v16 }
  0x3f   : > { %394 = vmatprep.mubr.f32.mxu0 %v1271_v13  ;;  %495 = vmatprep.mubr.f32.mxu1 %v1271_v13 }
  0x42   : > { %1107 = vmatmul.mubr.msk.f32.gmra.mrb[6].mxu0 %vm280_vm1, %v277_v56  ;;  %1115 = vmatmul.mubr.msk.f32.gmra.mrb[6].mxu1 %vm280_vm1, %v277_v56 }
  0x43   : > { %400 = vmatprep.mubr.f32.mxu0 %v1271_v13  ;;  %501 = vmatprep.mubr.f32.mxu1 %v1271_v13 }
  0x46   : > { %1108 = vmatmul.mubr.msk.f32.gmra.mrb[8].mxu0 %vm280_vm1, %v278_v57  ;;  %1116 = vmatmul.mubr.msk.f32.gmra.mrb[8].mxu1 %vm280_vm1, %v278_v57 }
  0x47   : > { %406 = vmatprep.mubr.f32.mxu0 %v1271_v13  ;;  %507 = vmatprep.mubr.f32.mxu1 %v1271_v13 }
  0x4a   : > { %1109 = vmatmul.mubr.msk.f32.gmra.mrb[10].mxu0 %vm280_vm1, %v279_v58  ;;  %1117 = vmatmul.mubr.msk.f32.gmra.mrb[10].mxu1 %vm280_vm1, %v279_v58 }
  0x4b   : > { %708 = vmatprep.mubr.f32.mxu0 %v1271_v13  ;;  %779 = vmatprep.mubr.f32.mxu1 %v1271_v13 }
  0xa1   : > { %v520_v60 = vpop.permute.xlu0 %519  ;;  %v538_v19 = vpop.permute.xlu1 %537 }
  0xa5   : > { %v525_v7 = vpop.permute.xlu0 %524 }
 0x109   : > { %v378_v61 = vpop.f32.mrb[0].mxu0  ;;  %v479_v62 = vpop.f32.mrb[0].mxu1 }
 0x10a   : > { %v1420_v63 = vadd.f32 %v520_v60, %v378_v61  ;;  %v1422_v0 = vadd.f32 %v520_v60, %v479_v62  ;;  %v380_v1 = vpop.f32.mrb[1].mxu0  ;;  %v481_v2 = vpop.f32.mrb[1].mxu1 }
 0x10b   : > { %v1424_v3 = vadd.f32 %v520_v60, %v380_v1  ;;  %v1426_v4 = vadd.f32 %v520_v60, %v481_v2 }
 0x10c   : > { %v1122_v5 = vmul.f32 -1.442695, %v1420_v63  ;;  %v1124_v6 = vmul.f32 -1.442695, %v1422_v0 }
 0x10d   : > { %v1123_v8 = vmul.f32 -1.442695, %v1424_v3  ;;  %v1125_v9 = vmul.f32 -1.442695, %v1426_v4  ;;  %v384_v10 = vpop.f32.mrb[2].mxu0  ;;  %v485_v11 = vpop.f32.mrb[2].mxu1 }
 0x10e   : > { %1199 = vpow2.f32 %v1122_v5  ;;  %v1432_v12 = vadd.f32 %v525_v7, %v384_v10  ;;  %v1434_v14 = vadd.f32 %v525_v7, %v485_v11  ;;  %v386_v15 = vpop.f32.mrb[3].mxu0  ;;  %v487_v16 = vpop.f32.mrb[3].mxu1 }
 0x10f   : > { %1201 = vpow2.f32 %v1124_v6  ;;  %v1436_v17 = vadd.f32 %v525_v7, %v386_v15  ;;  %v1438_v18 = vadd.f32 %v525_v7, %v487_v16 }
 0x110   : > { %1203 = vpow2.f32 %v1123_v8  ;;  %v1126_v20 = vmul.f32 -1.442695, %v1432_v12  ;;  %v1128_v21 = vmul.f32 -1.442695, %v1434_v14 }
 0x111   : > { %1205 = vpow2.f32 %v1125_v9  ;;  %v1127_v22 = vmul.f32 -1.442695, %v1436_v17  ;;  %v1129_v23 = vmul.f32 -1.442695, %v1438_v18  ;;  %v390_v24 = vpop.f32.mrb[4].mxu0  ;;  %v491_v25 = vpop.f32.mrb[4].mxu1 }
 0x112   : > { %1207 = vpow2.f32 %v1126_v20  ;;  %v540_v26 = vadd.f32 %v538_v19, %v390_v24  ;;  %v542_v27 = vadd.f32 %v538_v19, %v491_v25  ;;  %v392_v28 = vpop.f32.mrb[5].mxu0  ;;  %v493_v31 = vpop.f32.mrb[5].mxu1 }
 0x113   : > { %1209 = vpow2.f32 %v1128_v21  ;;  %v541_v33 = vadd.f32 %v538_v19, %v392_v28  ;;  %v543_v34 = vadd.f32 %v538_v19, %v493_v31 }
 0x114   : > { %1211 = vpow2.f32 %v1127_v22  ;;  %v1118_v36 = vmul.f32 -1.442695, %v540_v26  ;;  %v1120_v37 = vmul.f32 -1.442695, %v542_v27 }
 0x115   : > { %1213 = vpow2.f32 %v1129_v23  ;;  %v1119_v38 = vmul.f32 -1.442695, %v541_v33  ;;  %v1121_v39 = vmul.f32 -1.442695, %v543_v34  ;;  %v1444_v40 = vpop.f32.mrb[6].mxu0  ;;  %v1446_v41 = vpop.f32.mrb[6].mxu1 }
 0x116   : > { %1215 = vpow2.f32 %v1118_v36  ;;  %v1448_v42 = vpop.f32.mrb[7].mxu0  ;;  %v1450_v43 = vpop.f32.mrb[7].mxu1 }
 0x117   : > { %1217 = vpow2.f32 %v1120_v37 }
 0x118   : > { %v1200_v44 = vpop.eup %1199  ;;  %1219 = vpow2.f32 %v1119_v38 }
 0x119   : > { %v1202_v45 = vpop.eup %1201  ;;  %v592_v46 = vadd.f32 1.0, %v1200_v44  ;;  %1221 = vpow2.f32 %v1121_v39  ;;  %v1452_v47 = vpop.f32.mrb[8].mxu0 }
 0x11a   : > { %v1454_v48 = vpop.f32.mrb[8].mxu1  ;;  %v1204_v49 = vpop.eup %1203  ;;  %v594_v50 = vadd.f32 1.0, %v1202_v45 }
 0x11b   : > { %v1456_v51 = vpop.f32.mrb[9].mxu0  ;;  %v1458_v52 = vpop.f32.mrb[9].mxu1  ;;  %1223 = vrcp.f32 %v592_v46  ;;  %v593_v54 = vadd.f32 1.0, %v1204_v49 }
 0x11c   : > { %v1206_v53 = vpop.eup %1205  ;;  %1225 = vrcp.f32 %v594_v50 }
 0x11d   : > { %v1208_v55 = vpop.eup %1207  ;;  %v595_v56 = vadd.f32 1.0, %v1206_v53  ;;  %1227 = vrcp.f32 %v593_v54  ;;  %v408_v59 = vpop.f32.mrb[10].mxu0 }
 0x11e   : > { %v1210_v57 = vpop.eup %1209  ;;  %v596_v58 = vadd.f32 1.0, %v1208_v55  ;;  %v509_v60 = vpop.f32.mrb[10].mxu1 }
 0x11f   : > { %v1212_v61 = vpop.eup %1211  ;;  %1229 = vrcp.f32 %v595_v56  ;;  %v598_v62 = vadd.f32 1.0, %v1210_v57  ;;  %v410_v1 = vpop.f32.mrb[11].mxu0 }
 0x120   : > { %v1460_v2 = vpop.f32.mrb[11].mxu1  ;;  %v1214_v5 = vpop.eup %1213  ;;  %1231 = vrcp.f32 %v596_v58  ;;  %v597_v6 = vadd.f32 1.0, %v1212_v61 }
 0x121   : > { %v1216_v7 = vpop.eup %1215  ;;  %1233 = vrcp.f32 %v598_v62  ;;  %v599_v8 = vadd.f32 1.0, %v1214_v5  ;;  %v793_v61 = vpop.permute.xlu1 %792 }
 0x122   : > { %v1218_v9 = vpop.eup %1217  ;;  %1235 = vrcp.f32 %v597_v6  ;;  %v556_v10 = vadd.f32 1.0, %v1216_v7 }
 0x123   : > { %v1220_v11 = vpop.eup %1219  ;;  %1237 = vrcp.f32 %v599_v8  ;;  %v558_v15 = vadd.f32 1.0, %v1218_v9 }
 0x124   : > { %v1222_v16 = vpop.eup %1221  ;;  %1239 = vrcp.f32 %v556_v10  ;;  %v557_v19 = vadd.f32 1.0, %v1220_v11 }
 0x125   : > { %1241 = vrcp.f32 %v558_v15  ;;  %v559_v20 = vadd.f32 1.0, %v1222_v16  ;;  %v1224_v21 = vpop.eup %1223 }
 0x126   : > { %1243 = vrcp.f32 %v557_v19  ;;  %v1226_v22 = vpop.eup %1225  ;;  %v616_v27 = vmul.f32 %v1224_v21, %v1420_v63 }
 0x127   : > { %1245 = vrcp.f32 %v559_v20  ;;  %v1228_v23 = vpop.eup %1227  ;;  %v618_v33 = vmul.f32 %v1226_v22, %v1422_v0 }
 0x128   : > { %v617_v37 = vmul.f32 %v1228_v23, %v1424_v3 }
 0x129   : > { %v1230_v24 = vpop.eup %1229 }
 0x12a   : > { %v1232_v25 = vpop.eup %1231  ;;  %v619_v45 = vmul.f32 %v1230_v24, %v1426_v4 }
 0x12b   : > { %v1234_v26 = vpop.eup %1233  ;;  %v620_v28 = vmul.f32 %v1232_v25, %v1432_v12 }
 0x12c   : > { %v1236_v31 = vpop.eup %1235  ;;  %v622_v34 = vmul.f32 %v1234_v26, %v1434_v14 }
 0x12d   : > { %v1238_v36 = vpop.eup %1237  ;;  %v1152_v38 = vpack.c.bf16 %v620_v28, %v616_v27  ;;  %v621_v39 = vmul.f32 %v1236_v31, %v1436_v17 }
 0x12e   : > { %v1240_v44 = vpop.eup %1239  ;;  %v1156_v46 = vpack.c.bf16 %v622_v34, %v618_v33  ;;  %v623_v49 = vmul.f32 %v1238_v36, %v1438_v18 }
 0x12f   : > { %v1242_v63 = vpop.eup %1241  ;;  %v1150_v50 = vpack.c.bf16 %v621_v39, %v617_v37  ;;  %v624_v12 = vmul.f32 %v1240_v44, %v1444_v40  ;;  %v628_v0 = vmul.f32 %v1240_v44, %v1452_v47  ;;  %v632_v53 = vmul.f32 %v1240_v44, %v408_v59 }
 0x130   : > { %v1244_v14 = vpop.eup %1243  ;;  %v1154_v54 = vpack.c.bf16 %v623_v49, %v619_v45  ;;  %v626_v3 = vmul.f32 %v1242_v63, %v1446_v41  ;;  %v630_v55 = vmul.f32 %v1242_v63, %v1454_v48  ;;  %v634_v17 = vmul.f32 %v1242_v63, %v509_v60  ;;  %v636_v41 = vld [vmem:[%s1549_s2 + $0x30] sm:$0xff] }
 0x131   : > { %v1246_v56 = vpop.eup %1245  ;;  %1151 = vmatprep.subr.bf16.mxu0 %v1150_v50  ;;  %v625_v4 = vmul.f32 %v1244_v14, %v1448_v42  ;;  %v1160_v57 = vpack.c.bf16 %v628_v0, %v624_v12  ;;  %v629_v18 = vmul.f32 %v1244_v14, %v1456_v51  ;;  %v633_v58 = vmul.f32 %v1244_v14, %v410_v1  ;;  %v638_v51 = vld [vmem:[%s1549_s2 + $0x40] sm:$0xf] }
 0x132   : > { %1155 = vmatprep.subr.bf16.mxu1 %v1154_v54  ;;  %1153 = vmatpush1.bf16.msra.mxu0 %v1152_v38  ;;  %v627_v40 = vmul.f32 %v1246_v56, %v1450_v43  ;;  %v1164_v47 = vpack.c.bf16 %v630_v55, %v626_v3  ;;  %v631_v59 = vmul.f32 %v1246_v56, %v1458_v52  ;;  %v637_v43 = vld [vmem:[%s1549_s2 + $0x38] sm:$0xff] }
 0x133   : > { %1157 = vmatpush1.bf16.msra.mxu1 %v1156_v46  ;;  %v1158_v48 = vpack.c.bf16 %v629_v18, %v625_v4  ;;  %v635_v42 = vmul.f32 %v1246_v56, %v1460_v2 }
 0x134   : > { %v1162_v60 = vpack.c.bf16 %v631_v59, %v627_v40 }
 0x135   : > { %1159 = vmatprep.subr.bf16.mxu0 %v1158_v48  ;;  %1130 = vmatmul.mubr.msk.f32.vlgmr.msra.gmra.mrb[12].mxu0 %vm640_vm2, %v636_v41 }
 0x136   : > { %1163 = vmatprep.subr.bf16.mxu1 %v1162_v60  ;;  %1131 = vmatmul.mubr.msk.f32.vlgmr.msra.gmra.mrb[12].mxu1 %vm640_vm2, %v636_v41 }
 0x137   : > { %1161 = vmatpush1.bf16.msra.mxu0 %v1160_v57  ;;  %1165 = vmatpush1.bf16.msra.mxu1 %v1164_v47 }
 0x138   : > { %810 = vmatprep.subr.mxu0 %v633_v58  ;;  %887 = vmatprep.subr.mxu1 %v635_v42 }
 0x139   : > { %870 = vmatprep.mubr.f32.mxu0 %v1271_v13  ;;  %947 = vmatprep.mubr.f32.mxu1 %v1271_v13 }
 0x13b   : > { %811 = vmatpush1.msra.mxu0 %v632_v53  ;;  %888 = vmatpush1.msra.mxu1 %v634_v17 }
 0x13c   : > { %1132 = vmatmul.mubr.msk.f32.vlgmr.msra.gmra.mrb[14].mxu0 %vm799_vm3, %v637_v43  ;;  %1134 = vmatmul.mubr.msk.f32.vlgmr.msra.gmra.mrb[14].mxu1 %vm799_vm3, %v637_v43 }
 0x13d   : > { %876 = vmatprep.mubr.f32.mxu0 %v1271_v13  ;;  %953 = vmatprep.mubr.f32.mxu1 %v1271_v13 }
 0x140   : > { %1133 = vmatmul.mubr.msk.f32.gmra.mrb[16].mxu0 %vm799_vm3, %v638_v51  ;;  %1135 = vmatmul.mubr.msk.f32.gmra.mrb[16].mxu1 %vm799_vm3, %v638_v51 }
 0x208   : > { %v710_v52 = vpop.f32.mrb[12].mxu0 }
 0x209   : > { %v786_v62 = vmul.f32 %v710_v52, %v1366_v32  ;;  %v781_v1 = vpop.f32.mrb[12].mxu1  ;;  %v712_v2 = vpop.f32.mrb[13].mxu0 }
 0x20a   : > { %v788_v5 = vmul.f32 %v781_v1, %v1368_v35  ;;  %v787_v6 = vmul.f32 %v712_v2, %v1362_v29  ;;  %v783_v7 = vpop.f32.mrb[13].mxu1 }
 0x20b   : > { %v789_v13 = vmul.f32 %v783_v7, %v1364_v30  ;;  %v795_v8 = vadd.f32 %v793_v61, %v786_v62 }
 0x20c   : > { %v796_v9 = vadd.f32 %v793_v61, %v787_v6  ;;  %v797_v10 = vadd.f32 %v793_v61, %v788_v5 }
 0x20d   : > { %v798_v11 = vadd.f32 %v793_v61, %v789_v13  ;;  %968 = vst [vmem:[%s1497_s5] sm:$0xff] %v795_v8 }
 0x20e   : > { %969 = vst [vmem:[%s1497_s5 + $0x8] sm:$0xff] %v796_v9  ;;  %970 = vst [vmem:[%s1497_s5 + $0x10] sm:$0xff] %v797_v10 }
 0x20f   : > { %971 = vst [vmem:[%s1497_s5 + $0x18] sm:$0xff] %v798_v11  ;;  %v872_v15 = vpop.f32.mrb[14].mxu0  ;;  %v949_v16 = vpop.f32.mrb[14].mxu1 }
 0x210   : > { %v960_v19 = vmul.f32 %v872_v15, %v1366_v32  ;;  %v962_v20 = vmul.f32 %v949_v16, %v1368_v35  ;;  %v874_v21 = vpop.f32.mrb[15].mxu0  ;;  %v951_v22 = vpop.f32.mrb[15].mxu1 }
 0x211   : > { %v961_v23 = vmul.f32 %v874_v21, %v1362_v29  ;;  %v963_v24 = vmul.f32 %v951_v22, %v1364_v30  ;;  %986 = sbr.rel (!%p1325_p5) target bundleno = 544 (0x220), region = 59 }
 0x212   : > { %972 = vst [vmem:[%s1497_s5 + $0x20] sm:$0xff] %v960_v19  ;;  %974 = vst [vmem:[%s1497_s5 + $0x30] sm:$0xff] %v962_v20 }
 0x213   : > { %973 = vst [vmem:[%s1497_s5 + $0x28] sm:$0xff] %v961_v23  ;;  %975 = vst [vmem:[%s1497_s5 + $0x38] sm:$0xff] %v963_v24  ;;  %v878_v25 = vpop.f32.mrb[16].mxu0  ;;  %v955_v26 = vpop.f32.mrb[16].mxu1 }
 0x214   : > { %v964_v27 = vmul.f32 %v878_v25, %v1366_v32  ;;  %v966_v28 = vmul.f32 %v955_v26, %v1368_v35  ;;  %v880_v31 = vpop.f32.mrb[17].mxu0  ;;  %v957_v33 = vpop.f32.mrb[17].mxu1 }
 0x215   : > { %v965_v34 = vmul.f32 %v880_v31, %v1362_v29  ;;  %v967_v36 = vmul.f32 %v957_v33, %v1364_v30  ;;  %v1002_v29 = vld [vmem:[%s1497_s5] sm:$0xff] (%p1325_p5)  ;;  %v1004_v30 = vld [vmem:[%s1497_s5 + $0x8] sm:$0xff] (%p1325_p5)  ;;  %v1006_v32 = vld [vmem:[%s1497_s5 + $0x10] sm:$0xff] (%p1325_p5) }
 0x216   : > { %976 = vst [vmem:[%s1497_s5 + $0x40] sm:$0xf] %v964_v27  ;;  %978 = vst [vmem:[%s1497_s5 + $0x50] sm:$0xf] %v966_v28  ;;  %v1008_v35 = vld [vmem:[%s1497_s5 + $0x18] sm:$0xff] (%p1325_p5) }
 0x217   : > { %977 = vst [vmem:[%s1497_s5 + $0x48] sm:$0xf] %v965_v34  ;;  %979 = vst [vmem:[%s1497_s5 + $0x58] sm:$0xf] %v967_v36 }
 0x218   : > { %1003 = vst [vmem:[%s989_s8] sm:$0xff] %v1002_v29  ;;  %1005 = vst [vmem:[%s989_s8 + $0x8] sm:$0xff] %v1004_v30 }
 0x219   : > { %v1010_v37 = vld [vmem:[%s1497_s5 + $0x20] sm:$0xff]  ;;  %1007 = vst [vmem:[%s989_s8 + $0x10] sm:$0xff] %v1006_v32  ;;  %1009 = vst [vmem:[%s989_s8 + $0x18] sm:$0xff] %v1008_v35  ;;  %v1014_v39 = vld [vmem:[%s1497_s5 + $0x30] sm:$0xff] }
 0x21a   : > { %v1012_v38 = vld [vmem:[%s1497_s5 + $0x28] sm:$0xff]  ;;  %1011 = vst [vmem:[%s989_s8 + $0x40] sm:$0xff] %v1010_v37  ;;  %v1016_v44 = vld [vmem:[%s1497_s5 + $0x38] sm:$0xff]  ;;  %1015 = vst [vmem:[%s989_s8 + $0x50] sm:$0xff] %v1014_v39 }
 0x21b   : > { %1013 = vst [vmem:[%s989_s8 + $0x48] sm:$0xff] %v1012_v38  ;;  %1017 = vst [vmem:[%s989_s8 + $0x58] sm:$0xff] %v1016_v44 }
 0x21d   : > { %v1018_v45 = vld [vmem:[%s1497_s5 + $0x40] sm:$0xff]  ;;  %v1022_v49 = vld [vmem:[%s1497_s5 + $0x50] sm:$0xff] }
 0x21e   : > { %1019 = vst [vmem:[%s989_s8 + $0x80] sm:$0xff] %v1018_v45  ;;  %v1020_v46 = vld [vmem:[%s1497_s5 + $0x48] sm:$0xff]  ;;  %v1024_v63 = vld [vmem:[%s1497_s5 + $0x58] sm:$0xff]  ;;  %1023 = vst [vmem:[%s989_s8 + $0x90] sm:$0xff] %v1022_v49 }
 0x21f   : > { %1021 = vst [vmem:[%s989_s8 + $0x88] sm:$0xff] %v1020_v46  ;;  %1025 = vst [vmem:[%s989_s8 + $0x98] sm:$0xff] %v1024_v63 }
 0x220 PF: > { %p10_p11 = scmp.ge.s32.totalorder %s1313_s16, 4   ;;  %s1552_s12 = smov %s1265_s13 }
 0x221   : > { %s1553_s13 = smov %s1323_s19  ;;  %s1554_s14 = smov %s1313_s16 }
 0x222   :  { %12 = sbr.rel (!%p10_p11) target bundleno = 2 (0x2), region = 116 }

</bundles_post_ra>
